<compile_context>
chip_gen: v5e
topology: v5e:2x2
jax: 0.10.0
libtpu: 0.0.40
codegen_flags: <defaults>
</compile_context>

<pallas_src>
import jax
import jax.numpy as jnp
from jax.experimental import pallas as pl
from jax.experimental.pallas import tpu as pltpu


NUM_CLASSES = 100
IN_FEATURES = 512
C_PAD = 128          # class axis padded to one lane-dense vreg width
MAX_TILE_B = 1024    # batch tile: ~5 MiB double-buffered VMEM, amortizes
                     # the ~0.35 us per-grid-step overhead


def _round_up(n, m):
    return ((n + m - 1) // m) * m


def fc3_softmax_kernel(x_ref, w_ref, b_ref, o_ref):
    # fc3: logits = x @ W + b  (bf16 MXU operands, f32 accumulation).
    # The bf16 cast happens here so x only ever makes one HBM trip as f32.
    x_bf = x_ref[...].astype(jnp.bfloat16)
    logits = jnp.dot(x_bf, w_ref[...], preferred_element_type=jnp.float32)
    logits = logits + b_ref[...]

    # Mask the 28 padded class columns so they contribute exactly 0 to the
    # softmax (exp(-1e30 - m) == 0 in f32).
    col = jax.lax.broadcasted_iota(jnp.int32, (1, C_PAD), 1)
    logits = jnp.where(col < NUM_CLASSES, logits, jnp.float32(-1e30))

    # Numerically stable softmax over the class axis with exact normalization
    # (plain division -> rows sum to 1 to f32 precision).
    m = jnp.max(logits, axis=-1, keepdims=True)
    e = jnp.exp(logits - m)
    denom = jnp.sum(e, axis=-1, keepdims=True)
    o_ref[...] = (e / denom).astype(o_ref.dtype)


def prepare_params(w, b):
    """One-time (parameter-load time) padding + bf16 cast of fc3 params.

    Hoisted out of the per-call hot path per the perf review.
    """
    w_pad = jnp.zeros((IN_FEATURES, C_PAD), dtype=jnp.bfloat16)
    w_pad = w_pad.at[:, :NUM_CLASSES].set(w.astype(jnp.bfloat16))
    b_pad = jnp.zeros((1, C_PAD), dtype=jnp.float32)
    b_pad = b_pad.at[:, :NUM_CLASSES].set(
        b.reshape(1, NUM_CLASSES).astype(jnp.float32))
    return w_pad, b_pad


@jax.jit
def mynet_forward(x, w_pad, b_pad):
    B = x.shape[0]

    # f32 x enters the kernel directly (sublane tile = 8 rows).  Large tiles
    # amortize per-step overhead; the last (possibly partial) block is handled
    # by Pallas edge-block masking -- no jnp.pad, no extra HBM copy of x.
    tile_b = min(MAX_TILE_B, _round_up(B, 8))
    grid = (pl.cdiv(B, tile_b),)

    cost = pl.CostEstimate(
        flops=2 * B * IN_FEATURES * C_PAD,
        transcendentals=B * C_PAD,
        bytes_accessed=int(x.size * 4 + w_pad.size * 2 + b_pad.size * 4
                           + B * C_PAD * 4),
    )

    out = pl.pallas_call(
        fc3_softmax_kernel,
        out_shape=jax.ShapeDtypeStruct((B, C_PAD), jnp.float32),
        grid=grid,
        in_specs=[
            pl.BlockSpec((tile_b, IN_FEATURES), lambda i: (i, 0)),
            pl.BlockSpec((IN_FEATURES, C_PAD), lambda i: (0, 0)),
            pl.BlockSpec((1, C_PAD), lambda i: (0, 0)),
        ],
        out_specs=pl.BlockSpec((tile_b, C_PAD), lambda i: (i, 0)),
        compiler_params=pltpu.CompilerParams(
            dimension_semantics=("parallel",)),
        cost_estimate=cost,
    )(x, w_pad, b_pad)

    # Keep the module's (B, num_classes) output contract.  The trailing slice
    # is an XLA copy; downstream consumers that tolerate the padded (B, 128)
    # buffer can read `out` directly instead.
    return out[:, :NUM_CLASSES]


if __name__ == "__main__":
    key = jax.random.PRNGKey(0)
    kx, kw, kb = jax.random.split(key, 3)

    B = 8  # small batch
    bound = 1.0 / (IN_FEATURES ** 0.5)  # mimics nn.Linear uniform init
    x = jax.random.normal(kx, (B, IN_FEATURES), dtype=jnp.float32)
    w = jax.random.uniform(kw, (IN_FEATURES, NUM_CLASSES), dtype=jnp.float32,
                           minval=-bound, maxval=bound)
    b = jax.random.uniform(kb, (NUM_CLASSES,), dtype=jnp.float32,
                           minval=-bound, maxval=bound)

    w_pad, b_pad = prepare_params(w, b)          # one-time param prep
    out = mynet_forward(x, w_pad, b_pad)
    out = jax.block_until_ready(out)

    # sanity: correct shape, rows sum to 1 exactly (exact division), matches
    # the f32 reference within bf16 operand tolerance.
    assert out.shape == (B, NUM_CLASSES)
    assert jnp.allclose(jnp.sum(out, axis=1), 1.0, atol=1e-3)
    ref = jax.nn.softmax(x @ w + b, axis=1)
    assert jnp.allclose(out, ref, atol=2e-2, rtol=2e-2)

    print("KERNEL_OK")
</pallas_src>

<mosaic_0001>
module attributes {stable_mosaic.version = 11 : i64} {
  func.func @fc3_softmax_kernel(%arg0: i32, %arg1: memref<8x512xf32, #tpu.memory_space<vmem>>, %arg2: memref<512x128xbf16, #tpu.memory_space<vmem>>, %arg3: memref<1x128xf32, #tpu.memory_space<vmem>>, %arg4: memref<8x128xf32, #tpu.memory_space<vmem>>) attributes {dimension_semantics = [#tpu.dimension_semantics<parallel>], iteration_bounds = array<i64: 1>, scalar_prefetch = 0 : i64, scratch_operands = 0 : i64, tpu.core_type = #tpu.core_type<tc>, window_params = [{transform_indices = @transform_0, window_bounds = array<i64: 8, 512>}, {pipeline_mode = #tpu.pipeline_mode<synchronous>, transform_indices = @transform_1, window_bounds = array<i64: 512, 128>}, {pipeline_mode = #tpu.pipeline_mode<synchronous>, transform_indices = @transform_2, window_bounds = array<i64: 1, 128>}, {transform_indices = @transform_3, window_bounds = array<i64: 8, 128>}]} {
    %c0 = arith.constant 0 : index
    %c0_0 = arith.constant 0 : index
    %0 = vector.load %arg1[%c0, %c0_0] : memref<8x512xf32, #tpu.memory_space<vmem>>, vector<8x512xf32>
    %1 = arith.truncf %0 : vector<8x512xf32> to vector<8x512xbf16>
    %c0_1 = arith.constant 0 : index
    %c0_2 = arith.constant 0 : index
    %2 = vector.load %arg2[%c0_1, %c0_2] : memref<512x128xbf16, #tpu.memory_space<vmem>>, vector<512x128xbf16>
    %cst = arith.constant dense<0.000000e+00> : vector<8x128xf32>
    %3 = tpu.matmul %1, %2, %cst {dimension_numbers = #tpu.dot_dimension_numbers<[1], [0], [0], [1], [0, 0, 1, 1], [], []>} : vector<8x512xbf16>, vector<512x128xbf16>, vector<8x128xf32> -> vector<8x128xf32>
    %c0_3 = arith.constant 0 : index
    %c0_4 = arith.constant 0 : index
    %4 = vector.load %arg3[%c0_3, %c0_4] : memref<1x128xf32, #tpu.memory_space<vmem>>, vector<1x128xf32>
    %5 = vector.broadcast %4 : vector<1x128xf32> to vector<8x128xf32>
    %6 = arith.addf %3, %5 : vector<8x128xf32>
    %7 = tpu.iota {dimensions = array<i32: 1>} : vector<1x128xi32>
    %c100_i32 = arith.constant 100 : i32
    %8 = vector.broadcast %c100_i32 : i32 to vector<1x128xi32>
    %9 = arith.cmpi slt, %7, %8 : vector<1x128xi32>
    %cst_5 = arith.constant -1.000000e+30 : f32
    %10 = vector.shape_cast %9 : vector<1x128xi1> to vector<1x128xi1>
    %11 = vector.broadcast %10 : vector<1x128xi1> to vector<8x128xi1>
    %12 = vector.broadcast %cst_5 : f32 to vector<8x128xf32>
    %13 = arith.select %11, %6, %12 : vector<8x128xi1>, vector<8x128xf32>
    %cst_6 = arith.constant dense<0xFF800000> : vector<8xf32>
    %14 = vector.multi_reduction <maximumf>, %13, %cst_6 [1] : vector<8x128xf32> to vector<8xf32>
    %15 = vector.shape_cast %14 : vector<8xf32> to vector<8x1xf32>
    %16 = vector.broadcast %15 : vector<8x1xf32> to vector<8x128xf32>
    %17 = arith.subf %13, %16 : vector<8x128xf32>
    %18 = math.exp %17 : vector<8x128xf32>
    %cst_7 = arith.constant dense<0.000000e+00> : vector<8xf32>
    %19 = vector.multi_reduction <add>, %18, %cst_7 [1] : vector<8x128xf32> to vector<8xf32>
    %20 = vector.shape_cast %19 : vector<8xf32> to vector<8x1xf32>
    %21 = vector.broadcast %20 : vector<8x1xf32> to vector<8x128xf32>
    %22 = arith.divf %18, %21 : vector<8x128xf32>
    %c0_8 = arith.constant 0 : index
    %c0_9 = arith.constant 0 : index
    %23 = vector.load %arg4[%c0_8, %c0_9] : memref<8x128xf32, #tpu.memory_space<vmem>>, vector<8x128xf32>
    tpu.vector_store %arg4[%c0_8, %c0_9], %22 {strides = array<i32>} : memref<8x128xf32, #tpu.memory_space<vmem>>, vector<8x128xf32>,
    return
  }
  func.func @transform_0(%arg0: i32) -> (i32, i32) {
    %c0_i32 = arith.constant 0 : i32
    %c0_i32_0 = arith.constant 0 : i32
    return %arg0, %c0_i32 : i32, i32
  }
  func.func @transform_1(%arg0: i32) -> (i32, i32) {
    %c0_i32 = arith.constant 0 : i32
    %c0_i32_0 = arith.constant 0 : i32
    %c0_i32_1 = arith.constant 0 : i32
    return %c0_i32, %c0_i32_0 : i32, i32
  }
  func.func @transform_2(%arg0: i32) -> (i32, i32) {
    %c0_i32 = arith.constant 0 : i32
    %c0_i32_0 = arith.constant 0 : i32
    %c0_i32_1 = arith.constant 0 : i32
    return %c0_i32, %c0_i32_0 : i32, i32
  }
  func.func @transform_3(%arg0: i32) -> (i32, i32) {
    %c0_i32 = arith.constant 0 : i32
    %c0_i32_0 = arith.constant 0 : i32
    return %arg0, %c0_i32 : i32, i32
  }
}

</mosaic_0001>

<bundles_post_ra>
// kernel: mynet_forward.1
= control target key start
LH: loop header
LB: loop body
LE: loop exit
PB: predicated region body
PF: predicated region fallthrough
CT: control target
= control target key end

     0   :  { %8 = vsyncpa [#allocation3], 0  ;;  %s697_s0 = inlined_call_operand.hbm [shape: f32[8,512], index: 0, kind: input, shape index: {}]   ;;  %s698_s1 = inlined_call_operand.hbm [shape: bf16[512,128], index: 1, kind: input, shape index: {}]   ;;  %s699_s2 = inlined_call_operand.vmem [shape: f32[1,128], index: 2, kind: input, shape index: {}]   ;;  %s700_s3 = inlined_call_operand.hbm [shape: f32[8,128], index: 3, kind: output, shape index: {}]  }
   0x1   :  { %9 = vsyncpa [#allocation6], 0 }
   0x2   :  { %10 = vsyncpa [#allocation4], 0  ;;  %s16_s14 = sshll.u32 %s697_s0, 4  ;;  %s660_s15 = smov [#allocation2]   ;;  %s17_s14 = int_to_ptr.hbm [resolvable:$true] %s16_s14 }
   0x3   :  { %s18_s16 = sshll.u32 %s660_s15, 4  ;;  %s26_s19 = sshll.u32 %s698_s1, 4  ;;  %s19_s16 = int_to_ptr.vmem [resolvable:$true] %s18_s16  ;;  %s27_s19 = int_to_ptr.hbm [resolvable:$true] %s26_s19 }
   0x4   :  { %21 = dma.hbm_to_vmem [thread:$0]  %s17_s14, 512, %s19_s16, [#allocation3]  }
   0x5   :  { %s661_s20 = smov [#allocation5]   ;;  %s662_s22 = smov 64  }
   0x6   :  { %s28_s21 = sshll.u32 %s661_s20, 4  ;;  %s663_s23 = smov 4   ;;  %s29_s21 = int_to_ptr.vmem [resolvable:$true] %s28_s21 }
   0x7   :  { %34 = dma.hbm_to_vmem [thread:$0]  %s27_s19, 4096, %s29_s21, [#allocation6], %s662_s22, %s662_s22, %s663_s23  }
   0x8   :  { %654 = dma.done.wait [#allocation3], 512  }
   0x9   :  { %655 = vsyncadd [#allocation3], 4294966784 }
   0xa   :  { %656 = dma.done.wait [#allocation6], 4096  }
   0xb   :  { %657 = vsyncadd [#allocation6], 4294963200  ;;  %v547_v0 = vld [vmem:[#allocation5 + $0x38] sm:$0xff]  ;;  %v546_v4 = vld [vmem:[#allocation5 + $0x30] sm:$0xff]  ;;  %v365_v44 = vlaneseq  ;;  %s401_s27 = sshll.u32 %s700_s3, 4  ;;  %s402_s27 = int_to_ptr.hbm [resolvable:$true] %s401_s27 }
   0xc   :  { %v555_v1 = vld [vmem:[#allocation5 + $0x78] sm:$0xff]  ;;  %313 = vmatpush.bf16.msra.mxu0 %v547_v0  ;;  %v554_v5 = vld [vmem:[#allocation5 + $0x70] sm:$0xff]  ;;  %v545_v8 = vld [vmem:[#allocation5 + $0x28] sm:$0xff] }
   0xd   :  { %v563_v2 = vld [vmem:[#allocation5 + $0xb8] sm:$0xff]  ;;  %326 = vmatpush.bf16.msra.mxu1 %v555_v1  ;;  %v562_v6 = vld [vmem:[#allocation5 + $0xb0] sm:$0xff]  ;;  %v553_v9 = vld [vmem:[#allocation5 + $0x68] sm:$0xff]  ;;  %v366_v46 = vand.u32 127, %v365_v44 }
   0xe   :  { %v571_v3 = vld [vmem:[#allocation5 + $0xf8] sm:$0xff]  ;;  %339 = vmatpush.bf16.msra.mxu2 %v563_v2  ;;  %v570_v7 = vld [vmem:[#allocation5 + $0xf0] sm:$0xff]  ;;  %v561_v10 = vld [vmem:[#allocation5 + $0xa8] sm:$0xff] }
   0xf   :  { %352 = vmatpush.bf16.msra.mxu3 %v571_v3  ;;  %v569_v11 = vld [vmem:[#allocation5 + $0xe8] sm:$0xff]  ;;  %v544_v12 = vld [vmem:[#allocation5 + $0x20] sm:$0xff]  ;;  %v543_v16 = vld [vmem:[#allocation5 + $0x18] sm:$0xff]  ;;  %vm367_vm0 = vcmp.lt.s32.totalorder %v366_v46, 100 }
  0x10   :  { %314 = vmatpush.bf16.msra.mxu0 %v546_v4  ;;  %v552_v13 = vld [vmem:[#allocation5 + $0x60] sm:$0xff]  ;;  %v551_v17 = vld [vmem:[#allocation5 + $0x58] sm:$0xff]  ;;  %v542_v20 = vld [vmem:[#allocation5 + $0x10] sm:$0xff] }
  0x11   :  { %327 = vmatpush.bf16.msra.mxu1 %v554_v5  ;;  %v560_v14 = vld [vmem:[#allocation5 + $0xa0] sm:$0xff]  ;;  %v559_v18 = vld [vmem:[#allocation5 + $0x98] sm:$0xff]  ;;  %v550_v21 = vld [vmem:[#allocation5 + $0x50] sm:$0xff] }
  0x12   :  { %340 = vmatpush.bf16.msra.mxu2 %v562_v6  ;;  %v568_v15 = vld [vmem:[#allocation5 + $0xe0] sm:$0xff]  ;;  %v567_v19 = vld [vmem:[#allocation5 + $0xd8] sm:$0xff]  ;;  %v558_v22 = vld [vmem:[#allocation5 + $0x90] sm:$0xff] }
  0x13   :  { %353 = vmatpush.bf16.msra.mxu3 %v570_v7  ;;  %v566_v23 = vld [vmem:[#allocation5 + $0xd0] sm:$0xff]  ;;  %v541_v24 = vld [vmem:[#allocation5 + $0x8] sm:$0xff]  ;;  %v540_v28 = vld [vmem:[#allocation5] sm:$0xff] }
  0x14   :  { %315 = vmatpush.bf16.msra.mxu0 %v545_v8  ;;  %v549_v25 = vld [vmem:[#allocation5 + $0x48] sm:$0xff]  ;;  %v548_v29 = vld [vmem:[#allocation5 + $0x40] sm:$0xff]  ;;  %v47_v34 = vld [vmem:[#allocation2 + $0x10] sm:$0xff] }
  0x15   :  { %328 = vmatpush.bf16.msra.mxu1 %v553_v9  ;;  %v557_v26 = vld [vmem:[#allocation5 + $0x88] sm:$0xff]  ;;  %v556_v30 = vld [vmem:[#allocation5 + $0x80] sm:$0xff]  ;;  %v48_v35 = vld [vmem:[#allocation2 + $0x18] sm:$0xff]  ;;  %v51_v38 = vpack.c.bf16 %v47_v34, %v47_v34 }
  0x16   :  { %341 = vmatpush.bf16.msra.mxu2 %v561_v10  ;;  %v565_v27 = vld [vmem:[#allocation5 + $0xc8] sm:$0xff]  ;;  %v45_v31 = vld [vmem:[#allocation2] sm:$0xff]  ;;  %v52_v39 = vpack.c.bf16 %v48_v35, %v48_v35 }
  0x17   :  { %354 = vmatpush.bf16.msra.mxu3 %v569_v11  ;;  %v46_v32 = vld [vmem:[#allocation2 + $0x8] sm:$0xff]  ;;  %v564_v33 = vld [vmem:[#allocation5 + $0xc0] sm:$0xff]  ;;  %v49_v36 = vpack.c.bf16 %v45_v31, %v45_v31 }
  0x18   :  { %316 = vmatpush.bf16.msra.mxu0 %v544_v12  ;;  %v50_v37 = vpack.c.bf16 %v46_v32, %v46_v32  ;;  %v577_v40 = vld [vmem:[%s699_s2] ss:$0 sm:$0xff]  ;;  %s664_s2 = smov [#allocation7]  }
  0x19   :  { %329 = vmatpush.bf16.msra.mxu1 %v552_v13  ;;  %s399_s24 = sshll.u32 %s664_s2, 4  ;;  %s400_s24 = int_to_ptr.vmem [resolvable:$true] %s399_s24 }
  0x1a   :  { %342 = vmatpush.bf16.msra.mxu2 %v560_v14 }
  0x1b   :  { %355 = vmatpush.bf16.msra.mxu3 %v568_v15 }
  0x1c   :  { %317 = vmatpush.bf16.msra.mxu0 %v543_v16 }
  0x1d   :  { %330 = vmatpush.bf16.msra.mxu1 %v551_v17 }
  0x1e   :  { %343 = vmatpush.bf16.msra.mxu2 %v559_v18 }
  0x1f   :  { %356 = vmatpush.bf16.msra.mxu3 %v567_v19 }
  0x20   :  { %318 = vmatpush.bf16.msra.mxu0 %v542_v20 }
  0x21   :  { %331 = vmatpush.bf16.msra.mxu1 %v550_v21 }
  0x22   :  { %344 = vmatpush.bf16.msra.mxu2 %v558_v22 }
  0x23   :  { %357 = vmatpush.bf16.msra.mxu3 %v566_v23 }
  0x24   :  { %319 = vmatpush.bf16.msra.mxu0 %v541_v24 }
  0x25   :  { %332 = vmatpush.bf16.msra.mxu1 %v549_v25 }
  0x26   :  { %345 = vmatpush.bf16.msra.mxu2 %v557_v26 }
  0x27   :  { %358 = vmatpush.bf16.msra.mxu3 %v565_v27 }
  0x28   :  { %320 = vmatpush.bf16.msra.mxu0 %v540_v28 }
  0x29   :  { %333 = vmatpush.bf16.msra.mxu1 %v548_v29 }
  0x2a   :  { %346 = vmatpush.bf16.msra.mxu2 %v556_v30 }
  0x2b   :  { %359 = vmatpush.bf16.msra.mxu3 %v564_v33  ;;  %321 = vmatmul.bf16.vlgmr.msra.gmra.mxu0 %v49_v36 }
  0x2c   :  { %334 = vmatmul.bf16.vlgmr.msra.gmra.mxu1 %v50_v37 }
  0x2d   :  { %347 = vmatmul.bf16.vlgmr.msra.gmra.mxu2 %v51_v38 }
  0x2e   :  { %360 = vmatmul.bf16.vlgmr.msra.gmra.mxu3 %v52_v39 }
  0xa8   :  { %v322_v41 = vpop.f32.mrf.mxu0 }
  0xa9   :  { %v335_v42 = vpop.f32.mrf.mxu1  ;;  %v323_v43 = vadd.f32 %v577_v40, %v322_v41 }
  0xab   :  { %v336_v45 = vadd.f32 %v335_v42, %v323_v43 }
  0xb0   :  { %v348_v47 = vpop.f32.mrf.mxu2  ;;  %v324_v50 = vpop.f32.mrf.mxu0 }
  0xb1   :  { %v361_v48 = vpop.f32.mrf.mxu3  ;;  %v349_v49 = vadd.f32 %v348_v47, %v336_v45  ;;  %v337_v51 = vpop.f32.mrf.mxu1 }
  0xb3   :  { %v362_v52 = vadd.f32 %v361_v48, %v349_v49 }
  0xb5   :  { %v370_v53 = vsel %vm367_vm0, %v362_v52, -1e+30 }
  0xb6   :  { %371 = vmax.xlane.f32.xlu0 %v370_v53 }
  0xb8   :  { %v350_v54 = vpop.f32.mrf.mxu2 }
  0xb9   :  { %v363_v55 = vpop.f32.mrf.mxu3 }
 0x129   :  { %v372_v56 = vpop.xlane.xlu0 %371 }
 0x12a   :  { %v373_v57 = vsub.f32 %v370_v53, %v372_v56 }
 0x12c   :  { %v374_v58 = vmul.f32 1.442695, %v373_v57 }
 0x12e   :  { %578 = vpow2.f32 %v374_v58 }
 0x134   :  { %v579_v59 = vpop.eup %578 }
 0x135   :  { %376 = vadd.xlane.f32.xlu0 %v579_v59 }
 0x1a8   :  { %v377_v60 = vpop.xlane.xlu0 %376 }
 0x1a9   :  { %580 = vrcp.f32 %v377_v60  ;;  %v389_v0 = vand.u32 2147483648, %v377_v60  ;;  %v387_v2 = vand.u32 2147483647, %v377_v60  ;;  %vm383_vm2 = vweird.f32 %v377_v60 }
 0x1ab   :  { %v390_v4 = vor.u32 1.1754944e-38, %v389_v0  ;;  %vm388_vm4 = vcmp.eq.f32.partialorder %v387_v2, 8.507059e+37 }
 0x1af   :  { %v581_v61 = vpop.eup %580 }
 0x1b0   :  { %v379_v62 = vmul.f32 %v581_v61, %v377_v60  ;;  %vm384_vm1 = vweird.f32 %v581_v61 }
 0x1b1   :  { %vm385_vm3 = vmor %vm383_vm2, %vm384_vm1 }
 0x1b2   :  { %v380_v63 = vsub.f32 1.0, %v379_v62 }
 0x1b4   :  { %v381_v1 = vmul.f32 %v581_v61, %v380_v63 }
 0x1b6   :  { %v382_v3 = vadd.f32 %v581_v61, %v381_v1 }
 0x1b8   :  { %v386_v5 = vsel %vm385_vm3, %v581_v61, %v382_v3 }
 0x1b9   :  { %v391_v6 = vsel %vm388_vm4, %v390_v4, %v386_v5 }
 0x1ba   :  { %v392_v7 = vmul.f32 %v579_v59, %v391_v6 }
 0x1bc   :  { %393 = vst [vmem:[#allocation7] sm:$0xff] %v392_v7 }
 0x1bd   :  { %404 = dma.vmem_to_hbm [thread:$0]  %s400_s24, 128, %s402_s27, [#allocation4]  }
 0x1be   :  { %658 = dma.done.wait [#allocation4], 128  }
 0x1bf   :  { %659 = vsyncadd [#allocation4], 4294967168 }
 0x1c0   :  { %409 = vsyncpa [#allocation3], 1 }
 0x1c1   :  { %410 = vsyncpa [#allocation6], 1 }
 0x1c2   :  { %411 = vsyncpa [#allocation4], 1 }

</bundles_post_ra>
